<compile_context>
chip_gen: v7x
topology: tpu7x:2x2x1
jax: 0.10.0
libtpu: 0.0.40
codegen_flags: <defaults>
</compile_context>

<pallas_src>
import functools

import jax
import jax.numpy as jnp
from jax.experimental import pallas as pl
from jax.experimental.pallas import tpu as pltpu


def _round_up(x: int, m: int) -> int:
    return ((x + m - 1) // m) * m


def generator_kernel(z_ref, w1_ref, b1_ref, w2_ref, b2_ref, out_ref):
    """Fused MLP tile: out = relu(z @ W1 + b1) @ W2 + b2.

    VMEM tile shapes:
      z_ref  : (B_TILE, K1)        K1 = noise_dim (tiny, e.g. 2)
      w1_ref : (K1, H_PAD)         H_PAD = hidden padded to 128
      b1_ref : (1, H_PAD)
      w2_ref : (H_PAD, H_OUT_PAD)  lane-padded W2 (only first OUT cols nonzero)
      b2_ref : (1, OUT)            unpadded bias
      out_ref: (B_TILE, OUT)       narrow store -- only the real columns
    """
    z = z_ref[...]                               # (B_TILE, K1)
    k1 = z_ref.shape[1]
    out_cols = out_ref.shape[1]

    # ---- Layer 1 on the VPU (K1 is degenerate; MXU would be ~1% utilized).
    h = b1_ref[...]                              # (1, H_PAD), broadcasts below
    for k in range(k1):                          # static, unrolled
        h = h + z[:, k:k + 1] * w1_ref[k:k + 1, :]
    h = jnp.maximum(h, 0.0)                      # ReLU, (B_TILE, H_PAD)

    # ---- Layer 2 on the MXU, f32 accumulation; slice to the real columns.
    o = jnp.dot(h, w2_ref[...], preferred_element_type=jnp.float32)
    out_ref[...] = (o[:, :out_cols] + b2_ref[...]).astype(out_ref.dtype)


def prepare_params(w1, b1, w2, b2):
    """Pad / reshape parameters ONCE (hoisted out of the per-call path).

    w1 : (noise_dim, hidden_dim)   (transposed vs PyTorch)
    b1 : (hidden_dim,)
    w2 : (hidden_dim, output_dim)  (transposed vs PyTorch)
    b2 : (output_dim,)
    """
    k1, h = w1.shape
    out = w2.shape[1]
    h_pad = _round_up(h, 128)
    out_pad = _round_up(out, 128)

    w1p = jnp.zeros((k1, h_pad), jnp.float32).at[:, :h].set(w1)
    b1p = jnp.zeros((1, h_pad), jnp.float32).at[:, :h].set(b1.reshape(1, h))
    w2p = jnp.zeros((h_pad, out_pad), jnp.float32).at[:h, :out].set(w2)
    b2r = b2.reshape(1, out).astype(jnp.float32)
    return w1p, b1p, w2p, b2r


@functools.partial(jax.jit, static_argnames=("b_tile",))
def generator_forward(z, w1p, b1p, w2p, b2r, *, b_tile=None):
    """Forward pass of the Generator MLP via a single fused Pallas kernel.

    z    : (B, noise_dim) float32
    w1p  : (noise_dim, H_PAD)      from prepare_params
    b1p  : (1, H_PAD)
    w2p  : (H_PAD, OUT_PAD)
    b2r  : (1, output_dim)
    returns (B, output_dim) float32
    """
    B, K1 = z.shape
    H_PAD = w1p.shape[1]
    OUT_PAD = w2p.shape[1]
    OUT = b2r.shape[1]

    # --- Batch tiling: big tiles amortize ~0.35 us per grid step; keep >=2
    # grid steps when possible so ("parallel",) shards across v7x's 2 TCs.
    B8 = _round_up(B, 8)
    if b_tile is None:
        target = 4096
        n_steps = pl.cdiv(B8, target)
        if B8 >= 16:
            n_steps = max(n_steps, 2)
        b_tile = _round_up(pl.cdiv(B8, n_steps), 8)
    b_tile = max(8, _round_up(b_tile, 8))
    B_PAD = _round_up(B, b_tile)

    if B_PAD != B:
        zp = jnp.zeros((B_PAD, K1), jnp.float32).at[:B, :].set(z)
    else:
        zp = z

    grid = (B_PAD // b_tile,)
    flops = 2 * B_PAD * K1 * H_PAD + 2 * B_PAD * H_PAD * OUT_PAD
    bytes_accessed = 4 * (B_PAD * K1 + K1 * H_PAD + H_PAD
                          + H_PAD * OUT_PAD + OUT + B_PAD * OUT)

    out_padded = pl.pallas_call(
        generator_kernel,
        out_shape=jax.ShapeDtypeStruct((B_PAD, OUT), jnp.float32),
        grid=grid,
        in_specs=[
            pl.BlockSpec((b_tile, K1), lambda i: (i, 0)),       # z tile
            pl.BlockSpec((K1, H_PAD), lambda i: (0, 0)),        # W1 resident
            pl.BlockSpec((1, H_PAD), lambda i: (0, 0)),         # b1 resident
            pl.BlockSpec((H_PAD, OUT_PAD), lambda i: (0, 0)),   # W2 resident
            pl.BlockSpec((1, OUT), lambda i: (0, 0)),           # b2 resident
        ],
        out_specs=pl.BlockSpec((b_tile, OUT), lambda i: (i, 0)),  # narrow store
        compiler_params=pltpu.CompilerParams(
            dimension_semantics=("parallel",)),                 # v7x: 2 TCs
        cost_estimate=pl.CostEstimate(
            flops=flops, transcendentals=0, bytes_accessed=bytes_accessed),
    )(zp, w1p, b1p, w2p, b2r)

    if B_PAD != B:
        return out_padded[:B]
    return out_padded


def init_params(key, noise_dim=2, output_dim=2, hidden_dim=100):
    """PyTorch-style init: U(-1/sqrt(fan_in), 1/sqrt(fan_in)).

    Weights are stored transposed, i.e. (in_features, out_features);
    biases are 1-D, matching nn.Linear.
    """
    k1, k2, k3, k4 = jax.random.split(key, 4)
    bound1 = 1.0 / jnp.sqrt(jnp.float32(noise_dim))
    bound2 = 1.0 / jnp.sqrt(jnp.float32(hidden_dim))
    w1 = jax.random.uniform(k1, (noise_dim, hidden_dim), jnp.float32,
                            -bound1, bound1)
    b1 = jax.random.uniform(k2, (hidden_dim,), jnp.float32, -bound1, bound1)
    w2 = jax.random.uniform(k3, (hidden_dim, output_dim), jnp.float32,
                            -bound2, bound2)
    b2 = jax.random.uniform(k4, (output_dim,), jnp.float32, -bound2, bound2)
    return w1, b1, w2, b2


def reference_forward(z, w1, b1, w2, b2):
    """Pure-JAX reference for correctness checking."""
    h = jnp.maximum(z @ w1 + b1[None, :], 0.0)
    return h @ w2 + b2[None, :]


if __name__ == "__main__":
    noise_dim, output_dim, hidden_dim = 2, 2, 100

    key = jax.random.PRNGKey(0)
    k_params, k_z1, k_z2 = jax.random.split(key, 3)
    w1, b1, w2, b2 = init_params(k_params, noise_dim, output_dim, hidden_dim)
    w1p, b1p, w2p, b2r = prepare_params(w1, b1, w2, b2)   # padded once

    # Small-shape check (single grid step).
    z_small = jax.random.normal(k_z1, (8, noise_dim), jnp.float32)
    out_small = generator_forward(z_small, w1p, b1p, w2p, b2r)
    jax.block_until_ready(out_small)
    ref_small = reference_forward(z_small, w1, b1, w2, b2)
    assert out_small.shape == (8, output_dim)
    assert jnp.allclose(out_small, ref_small, atol=1e-5, rtol=1e-5), \
        "small-batch mismatch vs reference"

    # Larger, non-multiple-of-tile batch to exercise the grid, the >=2-step
    # split, and batch padding.
    z_big = jax.random.normal(k_z2, (1000, noise_dim), jnp.float32)
    out_big = generator_forward(z_big, w1p, b1p, w2p, b2r)
    jax.block_until_ready(out_big)
    ref_big = reference_forward(z_big, w1, b1, w2, b2)
    assert out_big.shape == (1000, output_dim)
    assert jnp.allclose(out_big, ref_big, atol=1e-5, rtol=1e-5), \
        "large-batch mismatch vs reference"

    print("KERNEL_OK")
</pallas_src>

<mosaic_0001>
module attributes {stable_mosaic.version = 11 : i64} {
  func.func @generator_kernel(%arg0: i32, %arg1: memref<8x2xf32, #tpu.memory_space<vmem>>, %arg2: memref<2x128xf32, #tpu.memory_space<vmem>>, %arg3: memref<1x128xf32, #tpu.memory_space<vmem>>, %arg4: memref<128x128xf32, #tpu.memory_space<vmem>>, %arg5: memref<1x2xf32, #tpu.memory_space<vmem>>, %arg6: memref<8x2xf32, #tpu.memory_space<vmem>>) attributes {dimension_semantics = [#tpu.dimension_semantics<parallel>], iteration_bounds = array<i64: 1>, scalar_prefetch = 0 : i64, scratch_operands = 0 : i64, tpu.core_type = #tpu.core_type<tc>, window_params = [{transform_indices = @transform_0, window_bounds = array<i64: 8, 2>}, {pipeline_mode = #tpu.pipeline_mode<synchronous>, transform_indices = @transform_1, window_bounds = array<i64: 2, 128>}, {pipeline_mode = #tpu.pipeline_mode<synchronous>, transform_indices = @transform_2, window_bounds = array<i64: 1, 128>}, {pipeline_mode = #tpu.pipeline_mode<synchronous>, transform_indices = @transform_3, window_bounds = array<i64: 128, 128>}, {pipeline_mode = #tpu.pipeline_mode<synchronous>, transform_indices = @transform_4, window_bounds = array<i64: 1, 2>}, {transform_indices = @transform_5, window_bounds = array<i64: 8, 2>}]} {
    %c0 = arith.constant 0 : index
    %c0_0 = arith.constant 0 : index
    %0 = vector.load %arg1[%c0, %c0_0] : memref<8x2xf32, #tpu.memory_space<vmem>>, vector<8x2xf32>
    %c0_1 = arith.constant 0 : index
    %c0_2 = arith.constant 0 : index
    %1 = vector.load %arg3[%c0_1, %c0_2] : memref<1x128xf32, #tpu.memory_space<vmem>>, vector<1x128xf32>
    %2 = vector.extract_strided_slice %0 {offsets = [0, 0], sizes = [8, 1], strides = [1, 1]} : vector<8x2xf32> to vector<8x1xf32>
    %c0_3 = arith.constant 0 : index
    %c0_4 = arith.constant 0 : index
    %3 = vector.load %arg2[%c0_3, %c0_4] : memref<2x128xf32, #tpu.memory_space<vmem>>, vector<1x128xf32>
    %4 = vector.broadcast %2 : vector<8x1xf32> to vector<8x128xf32>
    %5 = vector.broadcast %3 : vector<1x128xf32> to vector<8x128xf32>
    %6 = arith.mulf %4, %5 : vector<8x128xf32>
    %7 = vector.broadcast %1 : vector<1x128xf32> to vector<8x128xf32>
    %8 = arith.addf %7, %6 : vector<8x128xf32>
    %9 = vector.extract_strided_slice %0 {offsets = [0, 1], sizes = [8, 1], strides = [1, 1]} : vector<8x2xf32> to vector<8x1xf32>
    %c1 = arith.constant 1 : index
    %c0_5 = arith.constant 0 : index
    %10 = vector.load %arg2[%c1, %c0_5] : memref<2x128xf32, #tpu.memory_space<vmem>>, vector<1x128xf32>
    %11 = vector.broadcast %9 : vector<8x1xf32> to vector<8x128xf32>
    %12 = vector.broadcast %10 : vector<1x128xf32> to vector<8x128xf32>
    %13 = arith.mulf %11, %12 : vector<8x128xf32>
    %14 = arith.addf %8, %13 : vector<8x128xf32>
    %cst = arith.constant 0.000000e+00 : f32
    %15 = vector.broadcast %cst : f32 to vector<8x128xf32>
    %16 = arith.maximumf %14, %15 : vector<8x128xf32>
    %c0_6 = arith.constant 0 : index
    %c0_7 = arith.constant 0 : index
    %17 = vector.load %arg4[%c0_6, %c0_7] : memref<128x128xf32, #tpu.memory_space<vmem>>, vector<128x128xf32>
    %cst_8 = arith.constant dense<0.000000e+00> : vector<8x128xf32>
    %18 = tpu.matmul %16, %17, %cst_8 {dimension_numbers = #tpu.dot_dimension_numbers<[1], [0], [0], [1], [0, 0, 1, 1], [], []>} : vector<8x128xf32>, vector<128x128xf32>, vector<8x128xf32> -> vector<8x128xf32>
    %19 = vector.extract_strided_slice %18 {offsets = [0, 0], sizes = [8, 2], strides = [1, 1]} : vector<8x128xf32> to vector<8x2xf32>
    %c0_9 = arith.constant 0 : index
    %c0_10 = arith.constant 0 : index
    %20 = vector.load %arg5[%c0_9, %c0_10] : memref<1x2xf32, #tpu.memory_space<vmem>>, vector<1x2xf32>
    %21 = vector.broadcast %20 : vector<1x2xf32> to vector<8x2xf32>
    %22 = arith.addf %19, %21 : vector<8x2xf32>
    %c0_11 = arith.constant 0 : index
    %c0_12 = arith.constant 0 : index
    %23 = vector.load %arg6[%c0_11, %c0_12] : memref<8x2xf32, #tpu.memory_space<vmem>>, vector<8x2xf32>
    tpu.vector_store %arg6[%c0_11, %c0_12], %22 {strides = array<i32>} : memref<8x2xf32, #tpu.memory_space<vmem>>, vector<8x2xf32>,
    return
  }
  func.func @transform_0(%arg0: i32) -> (i32, i32) {
    %c0_i32 = arith.constant 0 : i32
    %c0_i32_0 = arith.constant 0 : i32
    return %arg0, %c0_i32 : i32, i32
  }
  func.func @transform_1(%arg0: i32) -> (i32, i32) {
    %c0_i32 = arith.constant 0 : i32
    %c0_i32_0 = arith.constant 0 : i32
    %c0_i32_1 = arith.constant 0 : i32
    return %c0_i32, %c0_i32_0 : i32, i32
  }
  func.func @transform_2(%arg0: i32) -> (i32, i32) {
    %c0_i32 = arith.constant 0 : i32
    %c0_i32_0 = arith.constant 0 : i32
    %c0_i32_1 = arith.constant 0 : i32
    return %c0_i32, %c0_i32_0 : i32, i32
  }
  func.func @transform_3(%arg0: i32) -> (i32, i32) {
    %c0_i32 = arith.constant 0 : i32
    %c0_i32_0 = arith.constant 0 : i32
    %c0_i32_1 = arith.constant 0 : i32
    return %c0_i32, %c0_i32_0 : i32, i32
  }
  func.func @transform_4(%arg0: i32) -> (i32, i32) {
    %c0_i32 = arith.constant 0 : i32
    %c0_i32_0 = arith.constant 0 : i32
    %c0_i32_1 = arith.constant 0 : i32
    return %c0_i32, %c0_i32_0 : i32, i32
  }
  func.func @transform_5(%arg0: i32) -> (i32, i32) {
    %c0_i32 = arith.constant 0 : i32
    %c0_i32_0 = arith.constant 0 : i32
    return %arg0, %c0_i32 : i32, i32
  }
}

</mosaic_0001>

<bundles_post_ra>
// kernel: generator_forward.1
= control target key start
LH: loop header
LB: loop body
LE: loop exit
PB: predicated region body
PF: predicated region fallthrough
CT: control target
= control target key end

     0   :  { %10 = vsyncpa [#allocation3], 0  ;;  %s281_s18 = smov [#allocation2]   ;;  %s349_s0 = inlined_call_operand.vmem [shape: f32[8,2], index: 0, kind: input, shape index: {}]   ;;  %s350_s1 = inlined_call_operand.vmem [shape: f32[2,128], index: 1, kind: input, shape index: {}]   ;;  %s351_s2 = inlined_call_operand.vmem [shape: f32[1,128], index: 2, kind: input, shape index: {}]   ;;  %s352_s3 = inlined_call_operand.hbm [shape: f32[128,128], index: 3, kind: input, shape index: {}]   ;;  %s353_s4 = inlined_call_operand.vmem [shape: f32[1,2], index: 4, kind: input, shape index: {}]   ;;  %s354_s5 = inlined_call_operand.vmem [shape: f32[8,2], index: 5, kind: output, shape index: {}]  }
   0x1   :  { %s22_s19 = sshll.u32 %s281_s18, 4  ;;  %s257_s22 = scalar_lea.hbm %s352_s3, 2048  ;;  %s23_s19 = int_to_ptr.vmem [resolvable:$true] %s22_s19 }
   0x2   :  { %p258_p0 = scmp.ne.s32.totalorder %s352_s3, %s257_s22  ;;  %p261_p1 = scmp.lt.u32.totalorder %s257_s22, %s352_s3 }
   0x4   :  { %p263_p2 = pnand %p261_p1, %p258_p0 }
   0x6   :  { %266 = shalt.err (!%p263_p2)
}
   0x7   :  { %s267_s27 = scalar_lea.vmem %s23_s19, 2048  ;;  %p272_p4 = scmp.lt.s32.totalorder %s23_s19, %s23_s19 }
   0x8   :  { %p268_p3 = scmp.ne.s32.totalorder %s23_s19, %s267_s27  ;;  %p273_p5 = scmp.lt.s32.totalorder %s267_s27, %s267_s27 }
   0xa   :  { %p274_p6 = por %p273_p5, %p272_p4 }
   0xc   :  { %p275_p7 = pnand %p274_p6, %p268_p3 }
   0xe   :  { %278 = shalt.err (!%p275_p7)
}
   0xf   :  { %s282_s28 = smov 128   ;;  %s283_s29 = smov 8  }
  0x10   :  { %28 = dma.hbm_to_vmem [thread:$0]  %s352_s3, 2048, %s23_s19, [#allocation3], %s282_s28, %s282_s28, %s283_s29  }
  0x11   :  { %279 = dma.done.wait [#allocation3], 2048  }
  0x12   :  { %280 = vsyncadd [#allocation3], 4294965248  ;;  %v284_v0 = vmov 0   ;;  %v285_v1 = vmov 0.0|0.0   ;;  %v34_v2 = vld [vmem:[%s349_s0] sm:$0xff]  ;;  %v67_v4 = vld [vmem:[#allocation2 + $0x8] sm:$0xff] }
  0x13   :  { %255 = vset.pattern.permute.xlu0 %v284_v0  ;;  %223 = vmatprep.subr.bf16.mxu0 %v285_v1  ;;  %v66_v3 = vld [vmem:[#allocation2] sm:$0xff]  ;;  %v68_v6 = vld [vmem:[#allocation2 + $0x10] sm:$0xff]  ;;  %v69_v7 = vld [vmem:[#allocation2 + $0x18] sm:$0xff]  ;;  %v286_v11 = vmov 1   ;;  %vm287_vm0 = vmmov 0   ;;  %v288_v16 = vmov 0.0  }
  0x14   :  { %39 = vperm.xlu0 %255, %v34_v2   ;;  %v224_v5 = vpack.c.bf16 %v67_v4, %v66_v3  ;;  %v227_v8 = vpack.c.bf16 %v69_v7, %v68_v6  ;;  %v70_v9 = vld [vmem:[#allocation2 + $0x20] sm:$0xff]  ;;  %v71_v10 = vld [vmem:[#allocation2 + $0x28] sm:$0xff]  ;;  %v72_v13 = vld [vmem:[#allocation2 + $0x30] sm:$0xff]  ;;  %220 = vmatprep.mubr.msk.f32.mxu0 %vm287_vm0, %v288_v16  ;;  %vm160_vm1 = vcmask 15360  }
  0x15   :  { %v230_v12 = vpack.c.bf16 %v71_v10, %v70_v9  ;;  %v73_v14 = vld [vmem:[#allocation2 + $0x38] sm:$0xff]  ;;  %v74_v17 = vld [vmem:[#allocation2 + $0x40] sm:$0xff]  ;;  %v75_v18 = vld [vmem:[#allocation2 + $0x48] sm:$0xff] }
  0x16   :  { %225 = vmatpush3.bf16.msra.mxu0 %v224_v5  ;;  %v233_v15 = vpack.c.bf16 %v73_v14, %v72_v13  ;;  %v236_v19 = vpack.c.bf16 %v75_v18, %v74_v17  ;;  %v76_v20 = vld [vmem:[#allocation2 + $0x50] sm:$0xff]  ;;  %v77_v21 = vld [vmem:[#allocation2 + $0x58] sm:$0xff]  ;;  %v78_v23 = vld [vmem:[#allocation2 + $0x60] sm:$0xff] }
  0x17   :  { %226 = vmatprep.subr.bf16.mxu0 %v285_v1  ;;  %v239_v22 = vpack.c.bf16 %v77_v21, %v76_v20  ;;  %v79_v24 = vld [vmem:[#allocation2 + $0x68] sm:$0xff]  ;;  %v80_v26 = vld [vmem:[#allocation2 + $0x70] sm:$0xff]  ;;  %v81_v27 = vld [vmem:[#allocation2 + $0x78] sm:$0xff] }
  0x18   :  { %256 = vset.pattern.permute.xlu0 %v286_v11  ;;  %v242_v25 = vpack.c.bf16 %v79_v24, %v78_v23  ;;  %v245_v28 = vpack.c.bf16 %v81_v27, %v80_v26  ;;  %v167_v29 = vld [vmem:[%s350_s1] ss:$0 sm:$0xff]  ;;  %v169_v33 = vld [vmem:[%s350_s1 + $0x1] ss:$0 sm:$0xff] }
  0x19   :  { %56 = vperm.xlu0 %256, %v34_v2   ;;  %v168_v32 = vld [vmem:[%s351_s2] ss:$0 sm:$0xff] }
  0x1a   :  { %228 = vmatpush3.bf16.msra.mxu0 %v227_v8  ;;  %v170_v39 = vld [vmem:[%s353_s4] ss:$0 sm:$0xff] }
  0x1b   :  { %229 = vmatprep.subr.bf16.mxu0 %v285_v1 }
  0x1e   :  { %231 = vmatpush3.bf16.msra.mxu0 %v230_v12 }
  0x1f   :  { %232 = vmatprep.subr.bf16.mxu0 %v285_v1 }
  0x22   :  { %234 = vmatpush3.bf16.msra.mxu0 %v233_v15 }
  0x23   :  { %235 = vmatprep.subr.bf16.mxu0 %v285_v1 }
  0x26   :  { %237 = vmatpush3.bf16.msra.mxu0 %v236_v19 }
  0x27   :  { %238 = vmatprep.subr.bf16.mxu0 %v285_v1 }
  0x2a   :  { %240 = vmatpush3.bf16.msra.mxu0 %v239_v22 }
  0x2b   :  { %241 = vmatprep.subr.bf16.mxu0 %v285_v1 }
  0x2e   :  { %243 = vmatpush3.bf16.msra.mxu0 %v242_v25 }
  0x2f   :  { %244 = vmatprep.subr.bf16.mxu0 %v285_v1 }
  0x32   :  { %246 = vmatpush3.bf16.msra.mxu0 %v245_v28 }
  0x93   :  { %v40_v30 = vpop.permute.xlu0 %39 }
  0x94   :  { %v46_v31 = vmul.f32 %v167_v29, %v40_v30 }
  0x96   :  { %v53_v35 = vadd.f32 %v168_v32, %v46_v31 }
  0x98   :  { %v57_v34 = vpop.permute.xlu0 %56 }
  0x99   :  { %v63_v36 = vmul.f32 %v169_v33, %v57_v34 }
  0x9b   :  { %v64_v37 = vadd.f32 %v63_v36, %v53_v35 }
  0x9d   :  { %v65_v38 = vmax.f32 %v64_v37, 0.0 }
  0x9f   :  { %221 = vmatmul.mubr.f32.vlgmr.msra.gmra.mrb[0].mxu0 %v65_v38 }
 0x172   :  { %v148_v40 = vpop.f32.mrb[0].mxu0 }
 0x173   :  { %v159_v41 = vadd.f32 %v170_v39, %v148_v40  ;;  %v222_v42 = vpop.f32.mrb[1].mxu0 }
 0x175   :  { %161 = vst.msk [vmem:[%s354_s5] sm:$0xff] %vm160_vm1, %v159_v41 }
 0x176   :  { %166 = vsyncpa [#allocation3], 1 }

</bundles_post_ra>
